<compile_context>
chip_gen: v7x
topology: tpu7x:2x2x1
jax: 0.10.0
libtpu: 0.0.40
codegen_flags: <defaults>
</compile_context>

<pallas_src>
import jax
import jax.numpy as jnp
from jax.experimental import pallas as pl
from jax.experimental.pallas import tpu as pltpu

LANES = 128      # vreg lane width
SUBLANES = 8     # vreg sublane depth


def _vmem_capacity_bytes(default_bytes: int = 64 << 20) -> int:
    """Physical VMEM per core; conservative 64 MiB fallback if the query fails."""
    try:
        cap = int(pltpu.get_tpu_info().vmem_capacity_bytes)
        return cap if cap > 0 else default_bytes
    except Exception:
        return default_bytes


_VMEM_CAP = _vmem_capacity_bytes()
# Leave headroom below physical VMEM; 48 MiB comfortably holds 4 x 8 MiB buffers.
_VMEM_LIMIT = min(48 << 20, (_VMEM_CAP * 3) // 4)
# 8 MiB f32 tiles when the raised limit allows double-buffered in+out; else 2 MiB.
_TILE_BYTES = (8 << 20) if _VMEM_LIMIT >= (40 << 20) else (2 << 20)
MAX_TILE_ROWS = _TILE_BYTES // (LANES * 4)


def gating_kernel(wb_ref, x_ref, o_ref):
    # wb_ref: SMEM (2,) f32 -> [w, b]; x_ref / o_ref: VMEM (tile_rows, 128) f32.
    w = wb_ref[0]
    b = wb_ref[1]
    z = w * x_ref[...] + b
    # sigmoid(z) = 0.5 * tanh(z / 2) + 0.5 : exact, overflow-free, and a single
    # EUP transcendental (the mul/adds ride the otherwise-idle VALU slots).
    o_ref[...] = 0.5 * jnp.tanh(0.5 * z) + 0.5


def _choose_tile_rows(rows: int) -> int:
    """Row-tile size: multiple of 8, <= MAX_TILE_ROWS, and >= 2 grid steps
    whenever possible so v7x's two TensorCores both get work."""
    if rows <= SUBLANES:
        return rows  # full-extent block: legal even when rows % 8 != 0
    half = pl.cdiv(rows, 2)
    tile = pl.cdiv(half, SUBLANES) * SUBLANES
    return min(tile, MAX_TILE_ROWS)


def _gating_2d(x2d: jax.Array, wb: jax.Array) -> jax.Array:
    rows, _ = x2d.shape
    tile_rows = _choose_tile_rows(rows)
    num_tiles = pl.cdiv(rows, tile_rows)
    n_eff = rows * LANES
    return pl.pallas_call(
        gating_kernel,
        out_shape=jax.ShapeDtypeStruct((rows, LANES), jnp.float32),
        grid=(num_tiles,),
        in_specs=[
            pl.BlockSpec(memory_space=pltpu.SMEM),               # w, b scalars
            pl.BlockSpec((tile_rows, LANES), lambda i: (i, 0)),  # token tile
        ],
        out_specs=pl.BlockSpec((tile_rows, LANES), lambda i: (i, 0)),
        compiler_params=pltpu.CompilerParams(
            dimension_semantics=("parallel",),
            vmem_limit_bytes=_VMEM_LIMIT,
        ),
        cost_estimate=pl.CostEstimate(
            flops=5 * n_eff, transcendentals=n_eff, bytes_accessed=8 * n_eff),
    )(wb, x2d)


def gating_network(log_probs: jax.Array, w, b) -> jax.Array:
    """log_probs: (num_tokens,) -> sigmoid(w * log_probs + b), float32."""
    n = log_probs.shape[0]
    x = log_probs.astype(jnp.float32)
    if n == 0:
        return jnp.zeros((0,), jnp.float32)
    wb = jnp.asarray([w, b], dtype=jnp.float32)

    if n % LANES == 0:
        # Zero-copy fast path: reshape of a contiguous vector is free, so total
        # HBM traffic is the ideal read-n + write-n.
        rows = n // LANES
        return _gating_2d(x.reshape(rows, LANES), wb).reshape(n)

    # Ragged path: pad only the last partial 128-lane row (< 128 dummy zeros);
    # one input copy + one output copy is unavoidable at the XLA level here,
    # but the dummy-element traffic is now negligible.
    rows = pl.cdiv(n, LANES)
    n_pad = rows * LANES
    x_padded = jnp.pad(x, (0, n_pad - n))
    out2d = _gating_2d(x_padded.reshape(rows, LANES), wb)
    return out2d.reshape(n_pad)[:n]


if __name__ == "__main__":
    # The nn.Module initializes w = b = 0.0; use non-trivial values so the
    # forward-pass semantics (sigmoid(w*x + b)) are actually exercised.
    w_param = 0.7
    b_param = -0.3

    key = jax.random.PRNGKey(0)

    # Small deterministic input consistent with the module: num_tokens = 8.
    num_tokens = 8
    log_probs = jax.random.normal(key, (num_tokens,), dtype=jnp.float32) - 2.0
    out = jax.block_until_ready(gating_network(log_probs, w_param, b_param))
    ref = jax.nn.sigmoid(w_param * log_probs + b_param)
    assert out.shape == (num_tokens,)
    assert jnp.allclose(out, ref, atol=1e-6), (out, ref)

    # 128-aligned fast path (single tile), a rows-not-multiple-of-8 case
    # (Pallas-masked partial last block, 2 grid steps), and a ragged length.
    for n, k in ((1024, 1), (1280, 2), (1000, 3)):
        lp = jax.random.normal(jax.random.PRNGKey(k), (n,), jnp.float32) - 2.0
        got = jax.block_until_ready(gating_network(lp, w_param, b_param))
        want = jax.nn.sigmoid(w_param * lp + b_param)
        assert got.shape == (n,)
        assert jnp.allclose(got, want, atol=1e-6), f"mismatch at n={n}"

    print("KERNEL_OK")
</pallas_src>

<mosaic_0001>
module attributes {stable_mosaic.version = 11 : i64} {
  func.func @gating_kernel(%arg0: i32, %arg1: memref<2xf32, #tpu.memory_space<smem>>, %arg2: memref<1x128xf32, #tpu.memory_space<vmem>>, %arg3: memref<1x128xf32, #tpu.memory_space<vmem>>) attributes {dimension_semantics = [#tpu.dimension_semantics<parallel>], iteration_bounds = array<i64: 1>, scalar_prefetch = 0 : i64, scratch_operands = 0 : i64, tpu.core_type = #tpu.core_type<tc>, window_params = [{transform_indices = @transform_0, window_bounds = array<i64: 2>}, {transform_indices = @transform_1, window_bounds = array<i64: 1, 128>}, {transform_indices = @transform_2, window_bounds = array<i64: 1, 128>}]} {
    %c0 = arith.constant 0 : index
    %0 = memref.load %arg1[%c0] : memref<2xf32, #tpu.memory_space<smem>>
    %c1 = arith.constant 1 : index
    %1 = memref.load %arg1[%c1] : memref<2xf32, #tpu.memory_space<smem>>
    %c0_0 = arith.constant 0 : index
    %c0_1 = arith.constant 0 : index
    %2 = vector.load %arg2[%c0_0, %c0_1] : memref<1x128xf32, #tpu.memory_space<vmem>>, vector<1x128xf32>
    %3 = vector.broadcast %0 : f32 to vector<1x128xf32>
    %4 = arith.mulf %3, %2 : vector<1x128xf32>
    %5 = vector.broadcast %1 : f32 to vector<1x128xf32>
    %6 = arith.addf %4, %5 : vector<1x128xf32>
    %cst = arith.constant 5.000000e-01 : f32
    %7 = vector.broadcast %cst : f32 to vector<1x128xf32>
    %8 = arith.mulf %7, %6 : vector<1x128xf32>
    %9 = math.tanh %8 : vector<1x128xf32>
    %cst_2 = arith.constant 5.000000e-01 : f32
    %10 = vector.broadcast %cst_2 : f32 to vector<1x128xf32>
    %11 = arith.mulf %10, %9 : vector<1x128xf32>
    %cst_3 = arith.constant 5.000000e-01 : f32
    %12 = vector.broadcast %cst_3 : f32 to vector<1x128xf32>
    %13 = arith.addf %11, %12 : vector<1x128xf32>
    %c0_4 = arith.constant 0 : index
    %c0_5 = arith.constant 0 : index
    %14 = vector.load %arg3[%c0_4, %c0_5] : memref<1x128xf32, #tpu.memory_space<vmem>>, vector<1x128xf32>
    tpu.vector_store %arg3[%c0_4, %c0_5], %13 {strides = array<i32>} : memref<1x128xf32, #tpu.memory_space<vmem>>, vector<1x128xf32>,
    return
  }
  func.func @transform_0(%arg0: i32) -> i32 {
    %c0_i32 = arith.constant 0 : i32
    %c0_i32_0 = arith.constant 0 : i32
    return %c0_i32 : i32
  }
  func.func @transform_1(%arg0: i32) -> (i32, i32) {
    %c0_i32 = arith.constant 0 : i32
    %c0_i32_0 = arith.constant 0 : i32
    return %arg0, %c0_i32 : i32, i32
  }
  func.func @transform_2(%arg0: i32) -> (i32, i32) {
    %c0_i32 = arith.constant 0 : i32
    %c0_i32_0 = arith.constant 0 : i32
    return %arg0, %c0_i32 : i32, i32
  }
}

</mosaic_0001>

<bundles_post_ra>
// kernel: tpu_custom_call.1
= control target key start
LH: loop header
LB: loop body
LE: loop exit
PB: predicated region body
PF: predicated region fallthrough
CT: control target
= control target key end

     0   :  { %7 = vsyncpa [#allocation4], 0  ;;  %s135_s0 = inlined_call_operand.hbm [shape: f32[2], index: 0, kind: input, shape index: {}]   ;;  %s136_s1 = inlined_call_operand.vmem [shape: f32[1,128], index: 1, kind: input, shape index: {}]   ;;  %s137_s2 = inlined_call_operand.hbm [shape: f32[1,128], index: 2, kind: output, shape index: {}]  }
   0x1   :  { %8 = vsyncpa [#allocation3], 0  ;;  %s55_s11 = scalar_lea.hbm %s135_s0, 16 }
   0x2   :  { %p56_p0 = scmp.ne.s32.totalorder %s135_s0, %s55_s11  ;;  %p59_p1 = scmp.lt.u32.totalorder %s55_s11, %s135_s0 }
   0x4   :  { %p61_p2 = pnand %p59_p1, %p56_p0 }
   0x6   :  { %64 = shalt.err (!%p61_p2)
}
   0x7   :  { %s91_s16 = smov [#allocation2]  }
   0x8   :  { %16 = dma.hbm_to_smem %s135_s0, 16, %s91_s16, [#allocation4]  }
   0x9   :  { %87 = dma.done.wait [#allocation4], 16  }
   0xa   :  { %88 = vsyncadd [#allocation4], 4294967280 }
   0xb   :  { %22 = sfence }
   0xc   :  { %s23_s19 = sld [smem:[#allocation2]]  ;;  %s50_s20 = sld [smem:[#allocation2 + $0x1]]  ;;  %v25_v0 = vld [vmem:[%s136_s1] sm:$0x1] }
   0xd   :  { %s92_s23 = smov [#allocation5]  }
   0xe   :  { %s41_s24 = sshll.u32 %s92_s23, 4  ;;  %s42_s24 = int_to_ptr.vmem [resolvable:$true] %s41_s24 }
   0xf   :  { %s65_s0 = scalar_lea.vmem %s42_s24, 16  ;;  %s69_s25 = scalar_lea.vmem %s42_s24, 32 }
  0x10   :  { %p66_p3 = scmp.ne.s32.totalorder %s42_s24, %s65_s0  ;;  %p70_p4 = scmp.lt.s32.totalorder %s42_s24, %s42_s24 }
  0x11   :  { %p71_p5 = scmp.lt.s32.totalorder %s69_s25, %s65_s0 }
  0x12   :  { %v26_v1 = vstv %s23_s19  ;;  %v28_v2 = vstv %s50_s20 }
  0x13   :  { %v27_v3 = vmul.f32 %v26_v1, %v25_v0  ;;  %p72_p6 = por %p71_p5, %p70_p4 }
  0x15   :  { %v29_v4 = vadd.f32 %v28_v2, %v27_v3  ;;  %p73_p7 = pnand %p72_p6, %p66_p3 }
  0x17   :  { %v30_v5 = vmul.f32 0.5, %v29_v4 }
  0x19   :  { %53 = vtanh.f32 %v30_v5 }
  0x23   :  { %v54_v6 = vpop.eup %53 }
  0x24   :  { %v32_v7 = vmul.f32 0.5, %v54_v6 }
  0x26   :  { %v33_v8 = vadd.f32 0.5, %v32_v7 }
  0x28   :  { %34 = vst [vmem:[#allocation5] sm:$0x1] %v33_v8 }
  0x29   :  { %76 = shalt.err (!%p73_p7)
}
  0x2a   :  { %s77_s27 = scalar_lea.hbm %s137_s2, 16 }
  0x2b   :  { %p78_p8 = scmp.ne.s32.totalorder %s137_s2, %s77_s27  ;;  %p81_p9 = scmp.lt.u32.totalorder %s77_s27, %s137_s2 }
  0x2d   :  { %p83_p10 = pnand %p81_p9, %p78_p8 }
  0x2f   :  { %86 = shalt.err (!%p83_p10)
}
  0x30   :  { %44 = dma.vmem_to_hbm [thread:$0]  %s42_s24, 16, %s137_s2, [#allocation3]  }
  0x31   :  { %89 = dma.done.wait [#allocation3], 16  }
  0x32   :  { %90 = vsyncadd [#allocation3], 4294967280 }
  0x33   :  { %48 = vsyncpa [#allocation3], 1 }
  0x34   :  { %49 = vsyncpa [#allocation4], 1 }

</bundles_post_ra>
